<compile_context>
chip_gen: v6e
topology: v6e:2x2x1
jax: 0.10.0
libtpu: 0.0.40
codegen_flags: <defaults>
</compile_context>

<pallas_src>
import functools

import jax
import jax.numpy as jnp
from jax.experimental import pallas as pl
from jax.experimental.pallas import tpu as pltpu

HIDDEN = 64
GROUP = 128            # vreg lane width — alignment unit for packed segments
_BATCH_TILE = 256      # batch tile once B grows (grid path)


def _round_up(x, m):
    return (x + m - 1) // m * m


# --------------------------------------------------------------------------
# Fused kernel: whole forward for one batch block.
# --------------------------------------------------------------------------
def _fused_kernel(x_ref, w1_ref, b1_ref, w2_ref, b2_ref, w3_ref, b3_ref,
                  out_ref, *, mean_w, group_w):
    w1 = w1_ref[...]
    x = x_ref[...].astype(w1.dtype)                     # bf16 feed for MXU

    # Layer 1 of every sub-network in ONE matmul (f32 accumulate, f32 tanh).
    h1 = jnp.tanh(jnp.dot(x, w1, preferred_element_type=jnp.float32)
                  + b1_ref[...])

    # Layer 2 of every sub-network in ONE block-diagonal matmul.
    # column layout (all 128-lane aligned):
    #   [ mean-l2 (padded to mean_w) | q group (128) | policy group (128) |
    #     termination group (128) ]
    w2 = w2_ref[...]
    h2 = jnp.dot(h1.astype(w2.dtype), w2,
                 preferred_element_type=jnp.float32) + b2_ref[...]

    q_off = mean_w
    p_off = mean_w + group_w
    t_off = mean_w + 2 * group_w

    hm2 = jnp.tanh(h2[:, :mean_w])                       # (B, mean_w) aligned
    q_grp = h2[:, q_off:q_off + group_w]                 # (B, 128) aligned
    p_grp = h2[:, p_off:p_off + group_w]                 # (B, 128) aligned
    t_grp = h2[:, t_off:t_off + group_w]                 # (B, 128) aligned

    # Layer 3 (intra-option mean nets) — ONE block-diagonal matmul,
    # output padded to a 128-lane group.
    w3 = w3_ref[...]
    means = jnp.tanh(jnp.dot(hm2.astype(w3.dtype), w3,
                             preferred_element_type=jnp.float32) + b3_ref[...])

    # policy-over-options softmax over the 128-lane group; padded lanes were
    # biased to -1e30 at pack time so they contribute exp(...) == 0.
    m = jnp.max(p_grp, axis=-1, keepdims=True)
    e = jnp.exp(p_grp - m)
    popt = e * pl.reciprocal(jnp.sum(e, axis=-1, keepdims=True), approx=True)

    betas = jax.nn.sigmoid(t_grp)

    # Single full-block, lane-dense store (no masked vst streams).
    out_ref[...] = jnp.concatenate([means, q_grp, popt, betas], axis=-1)


# --------------------------------------------------------------------------
# Parameter init (PyTorch Linear default: U(-1/sqrt(fan_in), 1/sqrt(fan_in))).
# --------------------------------------------------------------------------
def _linear(key, fan_in, fan_out):
    k1, k2 = jax.random.split(key)
    bound = 1.0 / float(fan_in) ** 0.5
    w = jax.random.uniform(k1, (fan_in, fan_out), jnp.float32, -bound, bound)
    b = jax.random.uniform(k2, (1, fan_out), jnp.float32, -bound, bound)
    return w, b


def init_params(key, obs_dim, n_actions, n_options, hidden=HIDDEN):
    keys = list(jax.random.split(key, 4 + 5 * n_options))
    it = iter(keys)
    p = {}
    # q_option_net
    p["w1q"], p["b1q"] = _linear(next(it), obs_dim, hidden)
    p["w2q"], p["b2q"] = _linear(next(it), hidden, n_options)
    # policy_over_options
    p["w1p"], p["b1p"] = _linear(next(it), obs_dim, hidden)
    p["w2p"], p["b2p"] = _linear(next(it), hidden, n_options)
    # intra-option policies (stacked over options)
    w1, b1, w2, b2, w3, b3 = [], [], [], [], [], []
    for _ in range(n_options):
        a, c = _linear(next(it), obs_dim, hidden); w1.append(a); b1.append(c)
        a, c = _linear(next(it), hidden, hidden);  w2.append(a); b2.append(c)
        a, c = _linear(next(it), hidden, n_actions); w3.append(a); b3.append(c)
    p["w1"] = jnp.stack(w1); p["b1"] = jnp.stack(b1)
    p["w2"] = jnp.stack(w2); p["b2"] = jnp.stack(b2)
    p["w3"] = jnp.stack(w3); p["b3"] = jnp.stack(b3)
    p["std"] = jnp.zeros((n_options, 1, n_actions), jnp.float32)  # nn.Parameter(zeros)
    # termination functions (stacked over options)
    wt1, bt1, wt2, bt2 = [], [], [], []
    for _ in range(n_options):
        a, c = _linear(next(it), obs_dim, hidden); wt1.append(a); bt1.append(c)
        a, c = _linear(next(it), hidden, 1);       wt2.append(a); bt2.append(c)
    p["wt1"] = jnp.stack(wt1); p["bt1"] = jnp.stack(bt1)
    p["wt2"] = jnp.stack(wt2); p["bt2"] = jnp.stack(bt2)
    return p


# --------------------------------------------------------------------------
# One-time weight packing: wide concat + block-diagonals with 128-lane-aligned
# output groups; matmul weights stored in bf16, biases kept f32.
# NOTE: the zero-inflated block-diagonal w2 scales O(n_options^2); fine for
# O <= 4-8, switch layer 2 of the mean nets to a batched dot beyond that.
# --------------------------------------------------------------------------
def pack_params(p, hidden=HIDDEN, weight_dtype=jnp.bfloat16):
    H = hidden
    obs_dim = p["w1q"].shape[0]
    O = p["w2q"].shape[1]
    A = p["w3"].shape[-1]

    D1 = (2 * O + 2) * H                     # layer-1 output width
    MEAN2_W = _round_up(O * H, GROUP)        # layer-2 mean block, lane-padded
    MEAN3_W = _round_up(O * A, GROUP)        # layer-3 mean output, lane-padded
    D2 = MEAN2_W + 3 * GROUP                 # layer-2 output width (aligned groups)

    q_off = MEAN2_W
    p_off = MEAN2_W + GROUP
    t_off = MEAN2_W + 2 * GROUP

    w1 = jnp.zeros((obs_dim, D1), jnp.float32)
    b1 = jnp.zeros((1, D1), jnp.float32)
    w2 = jnp.zeros((D1, D2), jnp.float32)
    b2 = jnp.zeros((1, D2), jnp.float32)
    w3 = jnp.zeros((MEAN2_W, MEAN3_W), jnp.float32)
    b3 = jnp.zeros((1, MEAN3_W), jnp.float32)

    # padded policy-logit lanes: -1e30 bias so in-kernel softmax ignores them
    b2 = b2.at[:, p_off:p_off + GROUP].set(-1e30)

    for i in range(O):
        # intra-option mean nets (IntraOptionPolicy.net_mean)
        w1 = w1.at[:, i * H:(i + 1) * H].set(p["w1"][i])
        b1 = b1.at[:, i * H:(i + 1) * H].set(p["b1"][i])
        w2 = w2.at[i * H:(i + 1) * H, i * H:(i + 1) * H].set(p["w2"][i])
        b2 = b2.at[:, i * H:(i + 1) * H].set(p["b2"][i])
        w3 = w3.at[i * H:(i + 1) * H, i * A:(i + 1) * A].set(p["w3"][i])
        b3 = b3.at[:, i * A:(i + 1) * A].set(p["b3"][i])
        # termination nets
        w1 = w1.at[:, (O + i) * H:(O + i + 1) * H].set(p["wt1"][i])
        b1 = b1.at[:, (O + i) * H:(O + i + 1) * H].set(p["bt1"][i])
        w2 = w2.at[(O + i) * H:(O + i + 1) * H, t_off + i:t_off + i + 1].set(p["wt2"][i])
        b2 = b2.at[:, t_off + i:t_off + i + 1].set(p["bt2"][i])
    # q_option_net
    w1 = w1.at[:, 2 * O * H:2 * O * H + H].set(p["w1q"])
    b1 = b1.at[:, 2 * O * H:2 * O * H + H].set(p["b1q"])
    w2 = w2.at[2 * O * H:2 * O * H + H, q_off:q_off + O].set(p["w2q"])
    b2 = b2.at[:, q_off:q_off + O].set(p["b2q"])
    # policy_over_options
    w1 = w1.at[:, 2 * O * H + H:2 * O * H + 2 * H].set(p["w1p"])
    b1 = b1.at[:, 2 * O * H + H:2 * O * H + 2 * H].set(p["b1p"])
    w2 = w2.at[2 * O * H + H:2 * O * H + 2 * H, p_off:p_off + O].set(p["w2p"])
    b2 = b2.at[:, p_off:p_off + O].set(p["b2p"])

    return {"w1": w1.astype(weight_dtype), "b1": b1,
            "w2": w2.astype(weight_dtype), "b2": b2,
            "w3": w3.astype(weight_dtype), "b3": b3,
            "std": p["std"]}


# --------------------------------------------------------------------------
# Wrapper: one pallas_call; gridless at small B, batch-tiled "parallel" grid
# with resident weights at large B.  Slab unpacking + x-independent std in
# plain JAX.
# --------------------------------------------------------------------------
@jax.jit
def option_critic_forward(packed, x):
    B = x.shape[0]
    O = packed["std"].shape[0]
    A = packed["std"].shape[-1]
    MEAN2_W, MEAN3_W = packed["w3"].shape
    out_w = MEAN3_W + 3 * GROUP

    kernel = functools.partial(_fused_kernel, mean_w=MEAN2_W, group_w=GROUP)
    weight_args = (packed["w1"], packed["b1"], packed["w2"], packed["b2"],
                   packed["w3"], packed["b3"])
    out_shape = jax.ShapeDtypeStruct((B, out_w), jnp.float32)

    if B > _BATCH_TILE and B % _BATCH_TILE == 0:
        # Batch-tiled grid: weights stay resident (block index constant),
        # batch axis parallel (feeds v7x's second TensorCore / pipelines DMA).
        in_specs = ([pl.BlockSpec((_BATCH_TILE, x.shape[1]), lambda i: (i, 0))]
                    + [pl.BlockSpec(w.shape, lambda i: (0, 0))
                       for w in weight_args])
        out = pl.pallas_call(
            kernel,
            out_shape=out_shape,
            grid=(B // _BATCH_TILE,),
            in_specs=in_specs,
            out_specs=pl.BlockSpec((_BATCH_TILE, out_w), lambda i: (i, 0)),
            compiler_params=pltpu.CompilerParams(
                dimension_semantics=("parallel",),
                vmem_limit_bytes=32 * 1024 * 1024),
        )(x, *weight_args)
    else:
        vmem = pltpu.MemorySpace.VMEM
        out = pl.pallas_call(
            kernel,
            out_shape=out_shape,
            in_specs=[pl.BlockSpec(memory_space=vmem)] * 7,
            out_specs=pl.BlockSpec(memory_space=vmem),
        )(x, *weight_args)

    # Unpack the lane-aligned slab (cheap XLA slices).
    means_p = out[:, :O * A]                                        # (B, O*A)
    qvals = out[:, MEAN3_W:MEAN3_W + O]                             # (B, O)
    popt = out[:, MEAN3_W + GROUP:MEAN3_W + GROUP + O]              # (B, O)
    betas_p = out[:, MEAN3_W + 2 * GROUP:MEAN3_W + 2 * GROUP + O]   # (B, O)

    # torch.cat(..., dim=0) over the option list
    action_means = means_p.reshape(B, O, A).transpose(1, 0, 2).reshape(O * B, A)
    betas = betas_p.T.reshape(O * B, 1)
    # std is x-independent: softplus + broadcast in the wrapper.
    std = jax.nn.softplus(packed["std"])                            # (O, 1, A)
    action_stds = jnp.broadcast_to(std, (O, B, A)).reshape(O * B, A)

    return popt, qvals, action_means, action_stds, betas


# --------------------------------------------------------------------------
# Pure-JAX reference (un-packed f32 weights) for verification
# --------------------------------------------------------------------------
def reference_forward(p, x):
    def lin(x, w, b):
        return x @ w + b
    hq = jnp.tanh(lin(x, p["w1q"], p["b1q"]))
    qvals = lin(hq, p["w2q"], p["b2q"])
    hp = jnp.tanh(lin(x, p["w1p"], p["b1p"]))
    popt = jax.nn.softmax(lin(hp, p["w2p"], p["b2p"]), axis=-1)
    means, stds, betas = [], [], []
    n_options = p["w2q"].shape[1]
    for i in range(n_options):
        h1 = jnp.tanh(lin(x, p["w1"][i], p["b1"][i]))
        h2 = jnp.tanh(lin(h1, p["w2"][i], p["b2"][i]))
        mean = jnp.tanh(lin(h2, p["w3"][i], p["b3"][i]))
        std = jax.nn.softplus(p["std"][i])
        std = jnp.broadcast_to(std, mean.shape)
        ht = jnp.tanh(lin(x, p["wt1"][i], p["bt1"][i]))
        beta = jax.nn.sigmoid(lin(ht, p["wt2"][i], p["bt2"][i]))
        means.append(mean); stds.append(std); betas.append(beta)
    return (popt, qvals,
            jnp.concatenate(means, 0),
            jnp.concatenate(stds, 0),
            jnp.concatenate(betas, 0))


if __name__ == "__main__":
    OBS_DIM, N_ACTIONS, N_OPTIONS, BATCH = 16, 4, 3, 8

    key = jax.random.PRNGKey(0)
    k_param, k_x, k_xb = jax.random.split(key, 3)
    params = init_params(k_param, OBS_DIM, N_ACTIONS, N_OPTIONS)
    packed = pack_params(params)                     # one-time weight packing

    # bf16 weights => tolerances loosened per review (~1e-2 scale).
    RTOL = ATOL = 5e-2

    # --- small batch: gridless path -------------------------------------
    x = jax.random.normal(k_x, (BATCH, OBS_DIM), jnp.float32)
    outs = jax.block_until_ready(option_critic_forward(packed, x))
    refs = reference_forward(params, x)
    for o, r in zip(outs, refs):
        assert o.shape == r.shape, (o.shape, r.shape)
        assert jnp.allclose(o, r, rtol=RTOL, atol=ATOL), float(jnp.abs(o - r).max())

    # --- large batch: batch-tiled parallel grid, resident weights --------
    xb = jax.random.normal(k_xb, (2 * _BATCH_TILE, OBS_DIM), jnp.float32)
    outs_b = jax.block_until_ready(option_critic_forward(packed, xb))
    refs_b = reference_forward(params, xb)
    for o, r in zip(outs_b, refs_b):
        assert o.shape == r.shape, (o.shape, r.shape)
        assert jnp.allclose(o, r, rtol=RTOL, atol=ATOL), float(jnp.abs(o - r).max())

    print("KERNEL_OK")
</pallas_src>

<mosaic_0001>
module attributes {stable_mosaic.version = 11 : i64} {
  func.func @_fused_kernel(%arg0: memref<8x16xf32, #tpu.memory_space<vmem>>, %arg1: memref<16x512xbf16, #tpu.memory_space<vmem>>, %arg2: memref<1x512xf32, #tpu.memory_space<vmem>>, %arg3: memref<512x640xbf16, #tpu.memory_space<vmem>>, %arg4: memref<1x640xf32, #tpu.memory_space<vmem>>, %arg5: memref<256x128xbf16, #tpu.memory_space<vmem>>, %arg6: memref<1x128xf32, #tpu.memory_space<vmem>>, %arg7: memref<8x512xf32, #tpu.memory_space<vmem>>) attributes {dimension_semantics = [], scalar_prefetch = 0 : i64, scratch_operands = 0 : i64, tpu.core_type = #tpu.core_type<tc>} {
    %c0 = arith.constant 0 : index
    %c0_0 = arith.constant 0 : index
    %0 = vector.load %arg1[%c0, %c0_0] : memref<16x512xbf16, #tpu.memory_space<vmem>>, vector<16x512xbf16>
    %c0_1 = arith.constant 0 : index
    %c0_2 = arith.constant 0 : index
    %1 = vector.load %arg0[%c0_1, %c0_2] : memref<8x16xf32, #tpu.memory_space<vmem>>, vector<8x16xf32>
    %2 = arith.truncf %1 : vector<8x16xf32> to vector<8x16xbf16>
    %cst = arith.constant dense<0.000000e+00> : vector<8x512xf32>
    %3 = tpu.matmul %2, %0, %cst {dimension_numbers = #tpu.dot_dimension_numbers<[1], [0], [0], [1], [0, 0, 1, 1], [], []>} : vector<8x16xbf16>, vector<16x512xbf16>, vector<8x512xf32> -> vector<8x512xf32>
    %c0_3 = arith.constant 0 : index
    %c0_4 = arith.constant 0 : index
    %4 = vector.load %arg2[%c0_3, %c0_4] : memref<1x512xf32, #tpu.memory_space<vmem>>, vector<1x512xf32>
    %5 = vector.broadcast %4 : vector<1x512xf32> to vector<8x512xf32>
    %6 = arith.addf %3, %5 : vector<8x512xf32>
    %7 = math.tanh %6 : vector<8x512xf32>
    %c0_5 = arith.constant 0 : index
    %c0_6 = arith.constant 0 : index
    %8 = vector.load %arg3[%c0_5, %c0_6] : memref<512x640xbf16, #tpu.memory_space<vmem>>, vector<512x640xbf16>
    %9 = arith.truncf %7 : vector<8x512xf32> to vector<8x512xbf16>
    %cst_7 = arith.constant dense<0.000000e+00> : vector<8x640xf32>
    %10 = tpu.matmul %9, %8, %cst_7 {dimension_numbers = #tpu.dot_dimension_numbers<[1], [0], [0], [1], [0, 0, 1, 1], [], []>} : vector<8x512xbf16>, vector<512x640xbf16>, vector<8x640xf32> -> vector<8x640xf32>
    %c0_8 = arith.constant 0 : index
    %c0_9 = arith.constant 0 : index
    %11 = vector.load %arg4[%c0_8, %c0_9] : memref<1x640xf32, #tpu.memory_space<vmem>>, vector<1x640xf32>
    %12 = vector.broadcast %11 : vector<1x640xf32> to vector<8x640xf32>
    %13 = arith.addf %10, %12 : vector<8x640xf32>
    %14 = vector.extract_strided_slice %13 {offsets = [0, 0], sizes = [8, 256], strides = [1, 1]} : vector<8x640xf32> to vector<8x256xf32>
    %15 = math.tanh %14 : vector<8x256xf32>
    %16 = vector.extract_strided_slice %13 {offsets = [0, 256], sizes = [8, 128], strides = [1, 1]} : vector<8x640xf32> to vector<8x128xf32>
    %17 = vector.extract_strided_slice %13 {offsets = [0, 384], sizes = [8, 128], strides = [1, 1]} : vector<8x640xf32> to vector<8x128xf32>
    %18 = vector.extract_strided_slice %13 {offsets = [0, 512], sizes = [8, 128], strides = [1, 1]} : vector<8x640xf32> to vector<8x128xf32>
    %c0_10 = arith.constant 0 : index
    %c0_11 = arith.constant 0 : index
    %19 = vector.load %arg5[%c0_10, %c0_11] : memref<256x128xbf16, #tpu.memory_space<vmem>>, vector<256x128xbf16>
    %20 = arith.truncf %15 : vector<8x256xf32> to vector<8x256xbf16>
    %cst_12 = arith.constant dense<0.000000e+00> : vector<8x128xf32>
    %21 = tpu.matmul %20, %19, %cst_12 {dimension_numbers = #tpu.dot_dimension_numbers<[1], [0], [0], [1], [0, 0, 1, 1], [], []>} : vector<8x256xbf16>, vector<256x128xbf16>, vector<8x128xf32> -> vector<8x128xf32>
    %c0_13 = arith.constant 0 : index
    %c0_14 = arith.constant 0 : index
    %22 = vector.load %arg6[%c0_13, %c0_14] : memref<1x128xf32, #tpu.memory_space<vmem>>, vector<1x128xf32>
    %23 = vector.broadcast %22 : vector<1x128xf32> to vector<8x128xf32>
    %24 = arith.addf %21, %23 : vector<8x128xf32>
    %25 = math.tanh %24 : vector<8x128xf32>
    %cst_15 = arith.constant dense<0xFF800000> : vector<8xf32>
    %26 = vector.multi_reduction <maximumf>, %17, %cst_15 [1] : vector<8x128xf32> to vector<8xf32>
    %27 = vector.shape_cast %26 : vector<8xf32> to vector<8x1xf32>
    %28 = vector.broadcast %27 : vector<8x1xf32> to vector<8x128xf32>
    %29 = arith.subf %17, %28 : vector<8x128xf32>
    %30 = math.exp %29 : vector<8x128xf32>
    %cst_16 = arith.constant dense<0.000000e+00> : vector<8xf32>
    %31 = vector.multi_reduction <add>, %30, %cst_16 [1] : vector<8x128xf32> to vector<8xf32>
    %32 = vector.shape_cast %31 : vector<8xf32> to vector<8x1xf32>
    %33 = tpu.reciprocal %32 {approx = true} : vector<8x1xf32> -> vector<8x1xf32>
    %34 = vector.broadcast %33 : vector<8x1xf32> to vector<8x128xf32>
    %35 = arith.mulf %30, %34 : vector<8x128xf32>
    %36 = arith.negf %18 : vector<8x128xf32>
    %37 = math.exp %36 : vector<8x128xf32>
    %cst_17 = arith.constant 1.000000e+00 : f32
    %38 = vector.broadcast %cst_17 : f32 to vector<8x128xf32>
    %39 = arith.addf %38, %37 : vector<8x128xf32>
    %40 = arith.divf %38, %39 : vector<8x128xf32>
    %41 = tpu.concatenate %25, %16, %35, %40 in 1 : vector<8x128xf32>, vector<8x128xf32>, vector<8x128xf32>, vector<8x128xf32> -> vector<8x512xf32>
    %c0_18 = arith.constant 0 : index
    %c0_19 = arith.constant 0 : index
    %42 = vector.load %arg7[%c0_18, %c0_19] : memref<8x512xf32, #tpu.memory_space<vmem>>, vector<8x512xf32>
    tpu.vector_store %arg7[%c0_18, %c0_19], %41 {strides = array<i32>} : memref<8x512xf32, #tpu.memory_space<vmem>>, vector<8x512xf32>,
    return
  }
}

</mosaic_0001>

<bundles_post_ra>
// kernel: option_critic_forward.1
= control target key start
LH: loop header
LB: loop body
LE: loop exit
PB: predicated region body
PF: predicated region fallthrough
CT: control target
= control target key end

     0   :  { %12 = vsyncpa [#allocation3], 0  ;;  %s2500_s0 = inlined_call_operand.hbm [shape: f32[8,16], index: 0, kind: input, shape index: {}]   ;;  %s2501_s1 = inlined_call_operand.hbm [shape: bf16[16,512], index: 1, kind: input, shape index: {}]   ;;  %s2502_s2 = inlined_call_operand.vmem [shape: f32[1,512], index: 2, kind: input, shape index: {}]   ;;  %s2503_s3 = inlined_call_operand.hbm [shape: bf16[512,640], index: 3, kind: input, shape index: {}]   ;;  %s2504_s4 = inlined_call_operand.vmem [shape: f32[1,640], index: 4, kind: input, shape index: {}]   ;;  %s2505_s5 = inlined_call_operand.hbm [shape: bf16[256,128], index: 5, kind: input, shape index: {}]   ;;  %s2506_s6 = inlined_call_operand.hbm [shape: f32[1,128], index: 6, kind: input, shape index: {}]   ;;  %s2507_s7 = inlined_call_operand.vmem [shape: f32[8,512], index: 7, kind: output, shape index: {}]  }
   0x1   :  { %13 = vsyncpa [#allocation5], 0 }
   0x2   :  { %14 = vsyncpa [#allocation8], 0  ;;  %s2370_s24 = smov [#allocation4]  }
   0x3   :  { %s30_s25 = sshll.u32 %s2370_s24, 4  ;;  %s31_s25 = int_to_ptr.vmem [resolvable:$true] %s30_s25 }
   0x4   :  { %s2272_s26 = scalar_lea.vmem %s31_s25, 512  ;;  %p2277_p1 = scmp.lt.s32.totalorder %s31_s25, %s31_s25 }
   0x5   :  { %p2273_p0 = scmp.ne.s32.totalorder %s31_s25, %s2272_s26  ;;  %p2278_p2 = scmp.lt.s32.totalorder %s2272_s26, %s2272_s26 }
   0x7   :  { %p2279_p3 = por %p2278_p2, %p2277_p1 }
   0x9   :  { %p2280_p4 = pnand %p2279_p3, %p2273_p0 }
   0xb   :  { %2283 = shalt.err (!%p2280_p4)
}
   0xc   :  { %s2371_s27 = smov 256   ;;  %s2372_s28 = smov 16  }
   0xd   :  { %36 = dma.hbm_to_vmem [thread:$0]  %s2501_s1, 512, %s31_s25, [#allocation5], %s2371_s27, %s2371_s27, %s2372_s28  }
   0xe   :  { %s2373_s8 = smov [#allocation7]  }
   0xf   :  { %s58_s9 = sshll.u32 %s2373_s8, 4  ;;  %s59_s9 = int_to_ptr.vmem [resolvable:$true] %s58_s9 }
  0x10   :  { %s2292_s10 = scalar_lea.vmem %s59_s9, 2048  ;;  %p2297_p6 = scmp.lt.s32.totalorder %s59_s9, %s59_s9 }
  0x11   :  { %p2293_p5 = scmp.ne.s32.totalorder %s59_s9, %s2292_s10  ;;  %p2298_p7 = scmp.lt.s32.totalorder %s2292_s10, %s2292_s10 }
  0x13   :  { %p2299_p8 = por %p2298_p7, %p2297_p6 }
  0x15   :  { %p2300_p9 = pnand %p2299_p8, %p2293_p5 }
  0x17   :  { %2303 = shalt.err (!%p2300_p9)
}
  0x18   :  { %s2374_s11 = smov 64   ;;  %s2375_s12 = smov 4  }
  0x19   :  { %64 = dma.hbm_to_vmem [thread:$0]  %s2505_s5, 2048, %s59_s9, [#allocation8], %s2374_s11, %s2374_s11, %s2375_s12  }
  0x1a   :  { %s2376_s15 = smov [#allocation2]   ;;  %s2377_s17 = smov [#allocation6]  }
  0x1b   :  { %s21_s16 = sshll.u32 %s2376_s15, 4  ;;  %s44_s1 = sshll.u32 %s2377_s17, 4  ;;  %s22_s16 = int_to_ptr.vmem [resolvable:$true] %s21_s16  ;;  %s45_s1 = int_to_ptr.vmem [resolvable:$true] %s44_s1 }
  0x1c   :  { %s2312_s18 = scalar_lea.vmem %s22_s16, 128  ;;  %p2317_p11 = scmp.lt.s32.totalorder %s22_s16, %s22_s16 }
  0x1d   :  { %p2313_p10 = scmp.ne.s32.totalorder %s22_s16, %s2312_s18  ;;  %p2318_p12 = scmp.lt.s32.totalorder %s2312_s18, %s2312_s18 }
  0x1f   :  { %p2319_p13 = por %p2318_p12, %p2317_p11 }
  0x21   :  { %p2320_p0 = pnand %p2319_p13, %p2313_p10 }
  0x23   :  { %2323 = shalt.err (!%p2320_p0)
}
  0x24   :  { %24 = dma.hbm_to_vmem [thread:$0]  %s2500_s0, 128, %s22_s16, [#allocation3]  }
  0x25   :  { %s2332_s21 = scalar_lea.vmem %s45_s1, 20480  ;;  %p2337_p2 = scmp.lt.s32.totalorder %s45_s1, %s45_s1 }
  0x26   :  { %p2333_p1 = scmp.ne.s32.totalorder %s45_s1, %s2332_s21  ;;  %p2338_p3 = scmp.lt.s32.totalorder %s2332_s21, %s2332_s21 }
  0x28   :  { %p2339_p4 = por %p2338_p3, %p2337_p2 }
  0x2a   :  { %p2340_p5 = pnand %p2339_p4, %p2333_p1 }
  0x2c   :  { %2343 = shalt.err (!%p2340_p5)
}
  0x2d   :  { %s2378_s5 = smov 320   ;;  %s2379_s22 = smov 20  }
  0x2e   :  { %50 = dma.hbm_to_vmem [thread:$0]  %s2503_s3, 20480, %s45_s1, [#allocation5], %s2378_s5, %s2378_s5, %s2379_s22  }
  0x2f   :  { %s2380_s25 = smov [#allocation9]  }
  0x30   :  { %s71_s26 = sshll.u32 %s2380_s25, 4  ;;  %s72_s26 = int_to_ptr.vmem [resolvable:$true] %s71_s26 }
  0x31   :  { %s2352_s27 = scalar_lea.vmem %s72_s26, 16  ;;  %s2356_s28 = scalar_lea.vmem %s72_s26, 32 }
  0x32   :  { %p2353_p6 = scmp.ne.s32.totalorder %s72_s26, %s2352_s27  ;;  %p2357_p7 = scmp.lt.s32.totalorder %s72_s26, %s72_s26 }
  0x33   :  { %p2358_p8 = scmp.lt.s32.totalorder %s2356_s28, %s2352_s27 }
  0x35   :  { %p2359_p9 = por %p2358_p8, %p2357_p7 }
  0x37   :  { %p2360_p10 = pnand %p2359_p9, %p2353_p6 }
  0x39   :  { %2363 = shalt.err (!%p2360_p10)
}
  0x3a   :  { %74 = dma.hbm_to_vmem [thread:$0]  %s2506_s6, 16, %s72_s26, [#allocation8]  }
  0x3b   :  { %2364 = dma.done.wait [#allocation3], 128  }
  0x3c   :  { %2365 = vsyncadd [#allocation3], 4294967168 }
  0x3d   :  { %2366 = dma.done.wait [#allocation5], 20992  }
  0x3e   :  { %2367 = vsyncadd [#allocation5], 4294946304 }
  0x3f   :  { %2368 = dma.done.wait [#allocation8], 2064  }
  0x40   :  { %2369 = vsyncadd [#allocation8], 4294965232  ;;  %v2381_v0 = vmov 0   ;;  %v1996_v1 = vld [vmem:[#allocation4 + $0x4] ss:$16 sps:$4 sm:$0xff]   ;;  %v95_v3 = vld [vmem:[#allocation2] sm:$0xff] }
  0x41   :  { %175 = vmatprep.mubr.bf16.mxu1 %v2381_v0  ;;  %v1998_v2 = vld [vmem:[#allocation4] ss:$16 sps:$4 sm:$0xff]   ;;  %157 = vmatprep.subr.bf16.mxu1 %v1996_v1  ;;  %v96_v4 = vpack.c.bf16 %v95_v3, %v95_v3  ;;  %v1999_v5 = vld [vmem:[#allocation4 + $0x8] ss:$16 sps:$4 sm:$0xff]   ;;  %v2001_v6 = vld [vmem:[#allocation4 + $0xc] ss:$16 sps:$4 sm:$0xff]  }
  0x42   :  { %158 = vmatpush1.bf16.msra.mxu1 %v1998_v2  ;;  %vm139_vm0 = vcmask 130048   ;;  %v2002_v7 = vld [vmem:[#allocation6 + $0x11c] ss:$20 sps:$4 sm:$0xff]   ;;  %v2004_v8 = vld [vmem:[#allocation6 + $0x118] ss:$20 sps:$4 sm:$0xff]  }
  0x43   :  { %198 = vmatprep.subr.bf16.mxu1 %v2001_v6  ;;  %1284 = vmatprep.subr.bf16.mxu0 %v2002_v7  ;;  %v2005_v9 = vld [vmem:[#allocation6 + $0xf4] ss:$20 sps:$4 sm:$0xff]   ;;  %v2007_v10 = vld [vmem:[#allocation6 + $0xf0] ss:$20 sps:$4 sm:$0xff]   ;;  %v2008_v11 = vld [vmem:[#allocation6 + $0xcc] ss:$20 sps:$4 sm:$0xff]  }
  0x44   :  { %1285 = vmatpush1.bf16.msra.mxu0 %v2004_v8  ;;  %v2012_v12 = vld [vmem:[#allocation6 + $0x39c] ss:$20 sps:$4 sm:$0xff]   ;;  %v2010_v13 = vld [vmem:[#allocation6 + $0x398] ss:$20 sps:$4 sm:$0xff]   ;;  %v2018_v16 = vld [vmem:[#allocation6 + $0x374] ss:$20 sps:$4 sm:$0xff]  }
  0x45   :  { %1738 = vmatmul.mubr.msk.bf16.vlgmr.msra.gmra.mxu1 %vm139_vm0, %v96_v4  ;;  %1286 = vmatprep.subr.bf16.mxu0 %v2005_v9  ;;  %v2013_v14 = vld [vmem:[#allocation6 + $0xc8] ss:$20 sps:$4 sm:$0xff]   ;;  %v2014_v15 = vld [vmem:[#allocation6 + $0xa4] ss:$20 sps:$4 sm:$0xff]   ;;  %v2019_v17 = vld [vmem:[#allocation6 + $0xa0] ss:$20 sps:$4 sm:$0xff]   ;;  %v99_v9 = vlaneseq }
  0x46   :  { %199 = vmatpush1.bf16.msra.mxu1 %v1999_v5  ;;  %216 = vmatprep.mubr.bf16.mxu1 %v2381_v0  ;;  %v2016_v18 = vld [vmem:[#allocation6 + $0x370] ss:$20 sps:$4 sm:$0xff]   ;;  %v2024_v20 = vld [vmem:[#allocation6 + $0x34c] ss:$20 sps:$4 sm:$0xff]   ;;  %v2022_v21 = vld [vmem:[#allocation6 + $0x348] ss:$20 sps:$4 sm:$0xff]  }
  0x47   :  { %1325 = vmatprep.subr.bf16.mxu1 %v2012_v12  ;;  %v2020_v19 = vld [vmem:[#allocation6 + $0x7c] ss:$20 sps:$4 sm:$0xff]   ;;  %v2025_v22 = vld [vmem:[#allocation6 + $0x78] ss:$20 sps:$4 sm:$0xff]   ;;  %v2026_v23 = vld [vmem:[#allocation6 + $0x54] ss:$20 sps:$4 sm:$0xff]  }
  0x48   :  { %1287 = vmatpush1.bf16.msra.mxu0 %v2007_v10  ;;  %v2030_v24 = vld [vmem:[#allocation6 + $0x324] ss:$20 sps:$4 sm:$0xff]   ;;  %v2028_v26 = vld [vmem:[#allocation6 + $0x320] ss:$20 sps:$4 sm:$0xff]   ;;  %v2036_v28 = vld [vmem:[#allocation6 + $0x2fc] ss:$20 sps:$4 sm:$0xff]  }
  0x49   :  { %1288 = vmatprep.subr.bf16.mxu0 %v2008_v11  ;;  %v2031_v25 = vld [vmem:[#allocation6 + $0x50] ss:$20 sps:$4 sm:$0xff]   ;;  %v2032_v27 = vld [vmem:[#allocation6 + $0x2c] ss:$20 sps:$4 sm:$0xff]   ;;  %v2037_v30 = vld [vmem:[#allocation6 + $0x28] ss:$20 sps:$4 sm:$0xff]  }
  0x4a   :  { %v2034_v29 = vld [vmem:[#allocation6 + $0x2f8] ss:$20 sps:$4 sm:$0xff]   ;;  %v2042_v32 = vld [vmem:[#allocation6 + $0x2d4] ss:$20 sps:$4 sm:$0xff]   ;;  %v2040_v33 = vld [vmem:[#allocation6 + $0x2d0] ss:$20 sps:$4 sm:$0xff]  }
  0x4b   :  { %v2038_v31 = vld [vmem:[#allocation6 + $0x4] ss:$20 sps:$4 sm:$0xff]   ;;  %v2043_v34 = vld [vmem:[#allocation6] ss:$20 sps:$4 sm:$0xff]   ;;  %v2044_v35 = vld [vmem:[#allocation6 + $0x25c] ss:$20 sps:$4 sm:$0xff]  }
  0x4c   :  { %1289 = vmatpush1.bf16.msra.mxu0 %v2013_v14  ;;  %v2048_v36 = vld [vmem:[#allocation6 + $0x2ac] ss:$20 sps:$4 sm:$0xff]   ;;  %v2046_v38 = vld [vmem:[#allocation6 + $0x2a8] ss:$20 sps:$4 sm:$0xff]   ;;  %v2054_v40 = vld [vmem:[#allocation6 + $0x284] ss:$20 sps:$4 sm:$0xff]  }
  0x4d   :  { %1739 = vmatmul.mubr.msk.bf16.vlgmr.msra.gmra.mxu1 %vm139_vm0, %v96_v4  ;;  %1290 = vmatprep.subr.bf16.mxu0 %v2014_v15  ;;  %v2049_v37 = vld [vmem:[#allocation6 + $0x258] ss:$20 sps:$4 sm:$0xff]   ;;  %v2050_v39 = vld [vmem:[#allocation6 + $0x234] ss:$20 sps:$4 sm:$0xff]   ;;  %v2055_v41 = vld [vmem:[#allocation6 + $0x230] ss:$20 sps:$4 sm:$0xff]  }
  0x4e   :  { %1326 = vmatpush1.bf16.msra.mxu1 %v2010_v13  ;;  %v2052_v42 = vld [vmem:[#allocation6 + $0x280] ss:$20 sps:$4 sm:$0xff]   ;;  %v2060_v44 = vld [vmem:[#allocation6 + $0x4dc] ss:$20 sps:$4 sm:$0xff]   ;;  %v2058_v46 = vld [vmem:[#allocation6 + $0x4d8] ss:$20 sps:$4 sm:$0xff]  }
  0x4f   :  { %1327 = vmatprep.subr.bf16.mxu1 %v2018_v16  ;;  %v2056_v43 = vld [vmem:[#allocation6 + $0x20c] ss:$20 sps:$4 sm:$0xff]   ;;  %v2061_v45 = vld [vmem:[#allocation6 + $0x208] ss:$20 sps:$4 sm:$0xff]   ;;  %v2062_v47 = vld [vmem:[#allocation6 + $0x1e4] ss:$20 sps:$4 sm:$0xff]  }
  0x50   :  { %1291 = vmatpush1.bf16.msra.mxu0 %v2019_v17  ;;  %v2066_v48 = vld [vmem:[#allocation6 + $0x4b4] ss:$20 sps:$4 sm:$0xff]   ;;  %v2064_v49 = vld [vmem:[#allocation6 + $0x4b0] ss:$20 sps:$4 sm:$0xff]   ;;  %v2072_v52 = vld [vmem:[#allocation6 + $0x48c] ss:$20 sps:$4 sm:$0xff]  }
  0x51   :  { %1292 = vmatprep.subr.bf16.mxu0 %v2020_v19  ;;  %v2067_v50 = vld [vmem:[#allocation6 + $0x1e0] ss:$20 sps:$4 sm:$0xff]   ;;  %v2068_v51 = vld [vmem:[#allocation6 + $0x1bc] ss:$20 sps:$4 sm:$0xff]   ;;  %v2073_v54 = vld [vmem:[#allocation6 + $0x1b8] ss:$20 sps:$4 sm:$0xff]  }
  0x52   :  { %1328 = vmatpush1.bf16.msra.mxu1 %v2016_v18  ;;  %v2070_v53 = vld [vmem:[#allocation6 + $0x488] ss:$20 sps:$4 sm:$0xff]   ;;  %v2078_v56 = vld [vmem:[#allocation6 + $0x464] ss:$20 sps:$4 sm:$0xff]   ;;  %v2076_v57 = vld [vmem:[#allocation6 + $0x460] ss:$20 sps:$4 sm:$0xff]  }
  0x53   :  { %1329 = vmatprep.subr.bf16.mxu1 %v2024_v20  ;;  %v2074_v55 = vld [vmem:[#allocation6 + $0x194] ss:$20 sps:$4 sm:$0xff]   ;;  %v2079_v58 = vld [vmem:[#allocation6 + $0x190] ss:$20 sps:$4 sm:$0xff]   ;;  %v2080_v59 = vld [vmem:[#allocation6 + $0x16c] ss:$20 sps:$4 sm:$0xff]  }
  0x54   :  { %1293 = vmatpush1.bf16.msra.mxu0 %v2025_v22  ;;  %v2084_v60 = vld [vmem:[#allocation6 + $0x43c] ss:$20 sps:$4 sm:$0xff]   ;;  %v2082_v61 = vld [vmem:[#allocation6 + $0x438] ss:$20 sps:$4 sm:$0xff]   ;;  %v2090_v0 = vld [vmem:[#allocation6 + $0x414] ss:$20 sps:$4 sm:$0xff]  }
  0x55   :  { %1294 = vmatprep.subr.bf16.mxu0 %v2026_v23  ;;  %v2085_v62 = vld [vmem:[#allocation6 + $0x168] ss:$20 sps:$4 sm:$0xff]   ;;  %v2086_v63 = vld [vmem:[#allocation6 + $0x144] ss:$20 sps:$4 sm:$0xff]   ;;  %v2091_v2 = vld [vmem:[#allocation6 + $0x140] ss:$20 sps:$4 sm:$0xff]  }
  0x56   :  { %1330 = vmatpush1.bf16.msra.mxu1 %v2022_v21  ;;  %v2088_v1 = vld [vmem:[#allocation6 + $0x410] ss:$20 sps:$4 sm:$0xff]   ;;  %v2094_v3 = vld [vmem:[#allocation6 + $0x3ec] ss:$20 sps:$4 sm:$0xff]   ;;  %v2092_v5 = vld [vmem:[#allocation6 + $0x3e8] ss:$20 sps:$4 sm:$0xff]  }
  0x57   :  { %1331 = vmatprep.subr.bf16.mxu1 %v2030_v24  ;;  %v2097_v4 = vld [vmem:[#allocation6 + $0x124] ss:$20 sps:$4 sm:$0xff]   ;;  %v2098_v7 = vld [vmem:[#allocation6 + $0x3c0] ss:$20 sps:$4 sm:$0xff]   ;;  %v2439_v10 = vshrl.u32 %v99_v9, 7 }
  0x58   :  { %1295 = vmatpush1.bf16.msra.mxu0 %v2031_v25  ;;  %v2100_v6 = vld [vmem:[#allocation6 + $0x3c4] ss:$20 sps:$4 sm:$0xff]   ;;  %v2149_v9 = vld [vmem:[#allocation6 + $0x288] ss:$20 sps:$4 sm:$0xff]  }
  0x59   :  { %1296 = vmatprep.subr.bf16.mxu0 %v2032_v27  ;;  %v2109_v8 = vld [vmem:[#allocation6 + $0x3a4] ss:$20 sps:$4 sm:$0xff]   ;;  %v101_v11 = vsub.s32 0, %v2439_v10  ;;  %v105_v13 = vsub.s32 1, %v2439_v10  ;;  %v109_v18 = vsub.s32 2, %v2439_v10  ;;  %v113_v21 = vsub.s32 3, %v2439_v10 }
  0x5a   :  { %1332 = vmatpush1.bf16.msra.mxu1 %v2028_v26  ;;  %v97_v12 = vld [vmem:[%s2502_s2] sm:$0xf] }
  0x5b   :  { %1333 = vmatprep.subr.bf16.mxu1 %v2036_v28  ;;  %v102_v14 = vrot.slane %v97_v12, %v101_v11  ;;  %v106_v15 = vrot.slane %v97_v12, %v105_v13  ;;  %v110_v23 = vrot.slane %v97_v12, %v109_v18  ;;  %v114_v25 = vrot.slane %v97_v12, %v113_v21  ;;  %v2154_v12 = vld [vmem:[#allocation6 + $0x214] ss:$20 sps:$4 sm:$0xff]  }
  0x5c   :  { %1297 = vmatpush1.bf16.msra.mxu0 %v2037_v30 }
  0x5d   :  { %1298 = vmatprep.subr.bf16.mxu0 %v2038_v31 }
  0x5e   :  { %1334 = vmatpush1.bf16.msra.mxu1 %v2034_v29 }
  0x5f   :  { %1335 = vmatprep.subr.bf16.mxu1 %v2042_v32 }
  0x60   :  { %1299 = vmatpush1.bf16.msra.mxu0 %v2043_v34 }
  0x61   :  { %1300 = vmatprep.subr.bf16.mxu0 %v2044_v35  ;;  %v2095_v35 = vld [vmem:[#allocation6 + $0x120] ss:$20 sps:$4 sm:$0xff]  }
  0x62   :  { %1336 = vmatpush1.bf16.msra.mxu1 %v2040_v33 }
  0x63   :  { %1337 = vmatprep.subr.bf16.mxu1 %v2048_v36 }
  0x64   :  { %1301 = vmatpush2.bf16.msra.mxu0 %v2049_v37  ;;  %v2103_v37 = vld [vmem:[#allocation6 + $0xfc] ss:$20 sps:$4 sm:$0xff]  }
  0x65   :  { %1302 = vmatprep.subr.bf16.mxu0 %v2050_v39  ;;  %v2106_v39 = vld [vmem:[#allocation6 + $0xd4] ss:$20 sps:$4 sm:$0xff]  }
  0x66   :  { %1338 = vmatpush1.bf16.msra.mxu1 %v2046_v38  ;;  %v2101_v38 = vld [vmem:[#allocation6 + $0xf8] ss:$20 sps:$4 sm:$0xff]  }
  0x67   :  { %1339 = vmatprep.subr.bf16.mxu1 %v2054_v40 }
  0x68   :  { %1303 = vmatpush2.bf16.msra.mxu0 %v2055_v41 }
  0x69   :  { %1304 = vmatprep.subr.bf16.mxu0 %v2056_v43  ;;  %v2104_v43 = vld [vmem:[#allocation6 + $0xd0] ss:$20 sps:$4 sm:$0xff]  }
  0x6a   :  { %1340 = vmatpush1.bf16.msra.mxu1 %v2052_v42 }
  0x6b   :  { %1341 = vmatprep.subr.bf16.mxu1 %v2060_v44  ;;  %v2107_v44 = vld [vmem:[#allocation6 + $0x3a0] ss:$20 sps:$4 sm:$0xff]  }
  0x6c   :  { %1305 = vmatpush2.bf16.msra.mxu0 %v2061_v45 }
  0x6d   :  { %1306 = vmatprep.subr.bf16.mxu0 %v2062_v47  ;;  %v2115_v47 = vld [vmem:[#allocation6 + $0x37c] ss:$20 sps:$4 sm:$0xff]  }
  0x6e   :  { %1342 = vmatpush2.bf16.msra.mxu1 %v2058_v46  ;;  %v2112_v46 = vld [vmem:[#allocation6 + $0xac] ss:$20 sps:$4 sm:$0xff]  }
  0x6f   :  { %1343 = vmatprep.subr.bf16.mxu1 %v2066_v48  ;;  %v2110_v48 = vld [vmem:[#allocation6 + $0xa8] ss:$20 sps:$4 sm:$0xff]  }
  0x70   :  { %1307 = vmatpush2.bf16.msra.mxu0 %v2067_v50  ;;  %v2118_v50 = vld [vmem:[#allocation6 + $0x84] ss:$20 sps:$4 sm:$0xff]  }
  0x71   :  { %1308 = vmatprep.subr.bf16.mxu0 %v2068_v51  ;;  %v2121_v51 = vld [vmem:[#allocation6 + $0x354] ss:$20 sps:$4 sm:$0xff]  }
  0x72   :  { %1344 = vmatpush2.bf16.msra.mxu1 %v2064_v49  ;;  %v2113_v49 = vld [vmem:[#allocation6 + $0x378] ss:$20 sps:$4 sm:$0xff]  }
  0x73   :  { %1345 = vmatprep.subr.bf16.mxu1 %v2072_v52  ;;  %v2116_v52 = vld [vmem:[#allocation6 + $0x80] ss:$20 sps:$4 sm:$0xff]  }
  0x74   :  { %1309 = vmatpush2.bf16.msra.mxu0 %v2073_v54  ;;  %v2124_v54 = vld [vmem:[#allocation6 + $0x5c] ss:$20 sps:$4 sm:$0xff]  }
  0x75   :  { %1310 = vmatprep.subr.bf16.mxu0 %v2074_v55  ;;  %v2127_v55 = vld [vmem:[#allocation6 + $0x32c] ss:$20 sps:$4 sm:$0xff]  }
  0x76   :  { %1346 = vmatpush2.bf16.msra.mxu1 %v2070_v53  ;;  %v2119_v53 = vld [vmem:[#allocation6 + $0x350] ss:$20 sps:$4 sm:$0xff]  }
  0x77   :  { %1347 = vmatprep.subr.bf16.mxu1 %v2078_v56  ;;  %v2122_v56 = vld [vmem:[#allocation6 + $0x58] ss:$20 sps:$4 sm:$0xff]  }
  0x78   :  { %1311 = vmatpush2.bf16.msra.mxu0 %v2079_v58  ;;  %v2130_v58 = vld [vmem:[#allocation6 + $0x34] ss:$20 sps:$4 sm:$0xff]  }
  0x79   :  { %1312 = vmatprep.subr.bf16.mxu0 %v2080_v59  ;;  %v2133_v59 = vld [vmem:[#allocation6 + $0x304] ss:$20 sps:$4 sm:$0xff]  }
  0x7a   :  { %1348 = vmatpush2.bf16.msra.mxu1 %v2076_v57  ;;  %v2125_v57 = vld [vmem:[#allocation6 + $0x328] ss:$20 sps:$4 sm:$0xff]  }
  0x7b   :  { %1349 = vmatprep.subr.bf16.mxu1 %v2084_v60  ;;  %v2128_v60 = vld [vmem:[#allocation6 + $0x30] ss:$20 sps:$4 sm:$0xff]  }
  0x7c   :  { %1313 = vmatpush2.bf16.msra.mxu0 %v2085_v62  ;;  %v2136_v62 = vld [vmem:[#allocation6 + $0xc] ss:$20 sps:$4 sm:$0xff]  }
  0x7d   :  { %1314 = vmatprep.subr.bf16.mxu0 %v2086_v63  ;;  %v2139_v63 = vld [vmem:[#allocation6 + $0x2dc] ss:$20 sps:$4 sm:$0xff]  }
  0x7e   :  { %1350 = vmatpush2.bf16.msra.mxu1 %v2082_v61  ;;  %v2131_v61 = vld [vmem:[#allocation6 + $0x300] ss:$20 sps:$4 sm:$0xff]  }
  0x7f   :  { %1351 = vmatprep.subr.bf16.mxu1 %v2090_v0  ;;  %v2134_v0 = vld [vmem:[#allocation6 + $0x8] ss:$20 sps:$4 sm:$0xff]  }
  0x80   :  { %1315 = vmatpush2.bf16.msra.mxu0 %v2091_v2  ;;  %v2142_v2 = vld [vmem:[#allocation6 + $0x264] ss:$20 sps:$4 sm:$0xff]  }
  0x81   :  { %1366 = vmatprep.subr.bf16.mxu0 %v2097_v4  ;;  %v2140_v4 = vld [vmem:[#allocation6 + $0x260] ss:$20 sps:$4 sm:$0xff]  }
  0x82   :  { %1352 = vmatpush2.bf16.msra.mxu1 %v2088_v1  ;;  %v2137_v1 = vld [vmem:[#allocation6 + $0x2d8] ss:$20 sps:$4 sm:$0xff]  }
  0x83   :  { %1353 = vmatprep.subr.bf16.mxu1 %v2094_v3  ;;  %v2145_v3 = vld [vmem:[#allocation6 + $0x2b4] ss:$20 sps:$4 sm:$0xff]  }
  0x86   :  { %1354 = vmatpush2.bf16.msra.mxu1 %v2092_v5  ;;  %v2143_v5 = vld [vmem:[#allocation6 + $0x2b0] ss:$20 sps:$4 sm:$0xff]  }
  0x87   :  { %1355 = vmatprep.subr.bf16.mxu1 %v2100_v6  ;;  %v2148_v6 = vld [vmem:[#allocation6 + $0x23c] ss:$20 sps:$4 sm:$0xff]  }
  0x8a   :  { %1356 = vmatpush2.bf16.msra.mxu1 %v2098_v7  ;;  %v2151_v7 = vld [vmem:[#allocation6 + $0x28c] ss:$20 sps:$4 sm:$0xff]  }
  0x8b   :  { %1407 = vmatprep.subr.bf16.mxu1 %v2109_v8  ;;  %v2146_v8 = vld [vmem:[#allocation6 + $0x238] ss:$20 sps:$4 sm:$0xff]  }
 0x105   :  { %v177_v16 = vpop.f32.mrf.mxu1 }
 0x106   :  { %v178_v17 = vadd.f32 %v177_v16, %v102_v14  ;;  %v2157_v14 = vld [vmem:[#allocation6 + $0x4e4] ss:$20 sps:$4 sm:$0xff]   ;;  %v2155_v16 = vld [vmem:[#allocation6 + $0x4e0] ss:$20 sps:$4 sm:$0xff]  }
 0x107   :  { %v179_v19 = vpop.f32.mrf.mxu1 }
 0x108   :  { %v180_v20 = vadd.f32 %v179_v19, %v106_v15  ;;  %2242 = vtanh.f32 %v178_v17  ;;  %v2152_v15 = vld [vmem:[#allocation6 + $0x210] ss:$20 sps:$4 sm:$0xff]   ;;  %v2160_v17 = vld [vmem:[#allocation6 + $0x1ec] ss:$20 sps:$4 sm:$0xff]  }
 0x109   :  { %v181_v22 = vpop.f32.mrf.mxu1  ;;  %v2163_v19 = vld [vmem:[#allocation6 + $0x4bc] ss:$20 sps:$4 sm:$0xff]  }
 0x10a   :  { %2244 = vtanh.f32 %v180_v20  ;;  %v2158_v20 = vld [vmem:[#allocation6 + $0x1e8] ss:$20 sps:$4 sm:$0xff]   ;;  %v2161_v22 = vld [vmem:[#allocation6 + $0x4b8] ss:$20 sps:$4 sm:$0xff]  }
 0x10b   :  { %v182_v24 = vpop.f32.mrf.mxu1 }
 0x10c   :  { %v2169_v24 = vld [vmem:[#allocation6 + $0x494] ss:$20 sps:$4 sm:$0xff]  }
 0x10d   :  { %v218_v26 = vpop.f32.mrf.mxu1 }
 0x10e   :  { %v219_v27 = vadd.f32 %v218_v26, %v110_v23  ;;  %v2166_v23 = vld [vmem:[#allocation6 + $0x1c4] ss:$20 sps:$4 sm:$0xff]  }
 0x10f   :  { %v220_v28 = vpop.f32.mrf.mxu1  ;;  %v2167_v26 = vld [vmem:[#allocation6 + $0x490] ss:$20 sps:$4 sm:$0xff]  }
 0x110   :  { %v221_v29 = vadd.f32 %v220_v28, %v114_v25  ;;  %2246 = vtanh.f32 %v219_v27  ;;  %v2164_v25 = vld [vmem:[#allocation6 + $0x1c0] ss:$20 sps:$4 sm:$0xff]   ;;  %v2172_v27 = vld [vmem:[#allocation6 + $0x19c] ss:$20 sps:$4 sm:$0xff]  }
 0x111   :  { %v222_v30 = vpop.f32.mrf.mxu1  ;;  %v2175_v28 = vld [vmem:[#allocation6 + $0x46c] ss:$20 sps:$4 sm:$0xff]  }
 0x112   :  { %2248 = vtanh.f32 %v221_v29  ;;  %v2170_v29 = vld [vmem:[#allocation6 + $0x198] ss:$20 sps:$4 sm:$0xff]   ;;  %v2173_v30 = vld [vmem:[#allocation6 + $0x468] ss:$20 sps:$4 sm:$0xff]  }
 0x113   :  { %v223_v31 = vpop.f32.mrf.mxu1 }
 0x114   :  { %v2178_v31 = vld [vmem:[#allocation6 + $0x174] ss:$20 sps:$4 sm:$0xff]  }
 0x115   :  { %v2243_v32 = vpop.eup %2242 }
 0x116   :  { %v2458_v36 = vpack.c.bf16 %v2243_v32, %v2243_v32  ;;  %v2181_v32 = vld [vmem:[#allocation6 + $0x444] ss:$20 sps:$4 sm:$0xff]  }
 0x117   :  { %v2245_v33 = vpop.eup %2244 }
 0x118   :  { %v2456_v34 = vpack.c.bf16 %v2245_v33, %v2245_v33  ;;  %v2176_v33 = vld [vmem:[#allocation6 + $0x170] ss:$20 sps:$4 sm:$0xff]  }
 0x11a   :  { %1316 = vmatprep.mubr.bf16.mxu0 %v2456_v34 }
 0x11b   :  { %1317 = vmatmul.mubr.bf16.vlgmr.msra.gmra.mxu0 %v2458_v36 }
 0x11c   :  { %1367 = vmatpush1.bf16.msra.mxu0 %v2095_v35  ;;  %1398 = vmatprep.mubr.bf16.mxu0 %v2456_v34  ;;  %v2179_v35 = vld [vmem:[#allocation6 + $0x440] ss:$20 sps:$4 sm:$0xff]  }
 0x11d   :  { %1368 = vmatprep.subr.bf16.mxu0 %v2103_v37  ;;  %v2247_v40 = vpop.eup %2246  ;;  %v2184_v37 = vld [vmem:[#allocation6 + $0x14c] ss:$20 sps:$4 sm:$0xff]  }
 0x11e   :  { %v2465_v45 = vpack.c.bf16 %v2247_v40, %v2247_v40  ;;  %v2185_v40 = vld [vmem:[#allocation6 + $0x418] ss:$20 sps:$4 sm:$0xff]  }
 0x11f   :  { %v2249_v41 = vpop.eup %2248 }
 0x120   :  { %1369 = vmatpush1.bf16.msra.mxu0 %v2101_v38  ;;  %v2463_v42 = vpack.c.bf16 %v2249_v41, %v2249_v41  ;;  %v2187_v38 = vld [vmem:[#allocation6 + $0x41c] ss:$20 sps:$4 sm:$0xff]   ;;  %v2190_v41 = vld [vmem:[#allocation6 + $0x3f4] ss:$20 sps:$4 sm:$0xff]  }
 0x121   :  { %1370 = vmatprep.subr.bf16.mxu0 %v2106_v39  ;;  %v2182_v39 = vld [vmem:[#allocation6 + $0x148] ss:$20 sps:$4 sm:$0xff]  }
 0x122   :  { %1357 = vmatprep.mubr.bf16.mxu1 %v2463_v42 }
 0x123   :  { %1358 = vmatmul.mubr.bf16.vlgmr.msra.gmra.mxu1 %v2465_v45 }
 0x124   :  { %1371 = vmatpush1.bf16.msra.mxu0 %v2104_v43  ;;  %1408 = vmatpush1.bf16.msra.mxu1 %v2107_v44  ;;  %v2191_v43 = vld [vmem:[#allocation6 + $0x268] ss:$20 sps:$4 sm:$0xff]   ;;  %v2188_v44 = vld [vmem:[#allocation6 + $0x3f0] ss:$20 sps:$4 sm:$0xff]  }
 0x125   :  { %1439 = vmatprep.mubr.bf16.mxu1 %v2463_v42  ;;  %1372 = vmatprep.subr.bf16.mxu0 %v2112_v46  ;;  %v2192_v46 = vld [vmem:[#allocation6 + $0x128] ss:$20 sps:$4 sm:$0xff]  }
 0x126   :  { %1409 = vmatprep.subr.bf16.mxu1 %v2115_v47  ;;  %v2195_v47 = vld [vmem:[#allocation6 + $0x3cc] ss:$20 sps:$4 sm:$0xff]  }
 0x128   :  { %1373 = vmatpush1.bf16.msra.mxu0 %v2110_v48  ;;  %1410 = vmatpush1.bf16.msra.mxu1 %v2113_v49  ;;  %v2196_v48 = vld [vmem:[#allocation6 + $0x240] ss:$20 sps:$4 sm:$0xff]   ;;  %v2193_v49 = vld [vmem:[#allocation6 + $0x3c8] ss:$20 sps:$4 sm:$0xff]  }
 0x129   :  { %1374 = vmatprep.subr.bf16.mxu0 %v2118_v50  ;;  %1411 = vmatprep.subr.bf16.mxu1 %v2121_v51  ;;  %v2197_v50 = vld [vmem:[#allocation6 + $0x100] ss:$20 sps:$4 sm:$0xff]   ;;  %v2198_v51 = vld [vmem:[#allocation6 + $0x218] ss:$20 sps:$4 sm:$0xff]  }
 0x12c   :  { %1375 = vmatpush1.bf16.msra.mxu0 %v2116_v52  ;;  %1412 = vmatpush1.bf16.msra.mxu1 %v2119_v53  ;;  %v2199_v52 = vld [vmem:[#allocation6 + $0x4e8] ss:$20 sps:$4 sm:$0xff]   ;;  %v2200_v53 = vld [vmem:[#allocation6 + $0xd8] ss:$20 sps:$4 sm:$0xff]  }
 0x12d   :  { %1376 = vmatprep.subr.bf16.mxu0 %v2124_v54  ;;  %1413 = vmatprep.subr.bf16.mxu1 %v2127_v55  ;;  %v2201_v54 = vld [vmem:[#allocation6 + $0x3a8] ss:$20 sps:$4 sm:$0xff]   ;;  %v2202_v55 = vld [vmem:[#allocation6 + $0x1f0] ss:$20 sps:$4 sm:$0xff]  }
 0x130   :  { %1377 = vmatpush1.bf16.msra.mxu0 %v2122_v56  ;;  %1414 = vmatpush1.bf16.msra.mxu1 %v2125_v57  ;;  %v2203_v56 = vld [vmem:[#allocation6 + $0x4c0] ss:$20 sps:$4 sm:$0xff]   ;;  %v2204_v57 = vld [vmem:[#allocation6 + $0xb0] ss:$20 sps:$4 sm:$0xff]  }
 0x131   :  { %1378 = vmatprep.subr.bf16.mxu0 %v2130_v58  ;;  %1415 = vmatprep.subr.bf16.mxu1 %v2133_v59  ;;  %v2205_v58 = vld [vmem:[#allocation6 + $0x380] ss:$20 sps:$4 sm:$0xff]   ;;  %v2207_v59 = vld [vmem:[#allocation6 + $0x498] ss:$20 sps:$4 sm:$0xff]  }
 0x134   :  { %1379 = vmatpush1.bf16.msra.mxu0 %v2128_v60  ;;  %1416 = vmatpush1.bf16.msra.mxu1 %v2131_v61  ;;  %v2208_v60 = vld [vmem:[#allocation6 + $0x88] ss:$20 sps:$4 sm:$0xff]   ;;  %v2209_v61 = vld [vmem:[#allocation6 + $0x358] ss:$20 sps:$4 sm:$0xff]  }
 0x135   :  { %1380 = vmatprep.subr.bf16.mxu0 %v2136_v62  ;;  %1417 = vmatprep.subr.bf16.mxu1 %v2139_v63  ;;  %v2210_v62 = vld [vmem:[#allocation6 + $0x1a0] ss:$20 sps:$4 sm:$0xff]   ;;  %v2211_v63 = vld [vmem:[#allocation6 + $0x470] ss:$20 sps:$4 sm:$0xff]  }
 0x138   :  { %1381 = vmatpush1.bf16.msra.mxu0 %v2134_v0  ;;  %1418 = vmatpush1.bf16.msra.mxu1 %v2137_v1  ;;  %v2212_v0 = vld [vmem:[#allocation6 + $0x60] ss:$20 sps:$4 sm:$0xff]   ;;  %v2213_v1 = vld [vmem:[#allocation6 + $0x330] ss:$20 sps:$4 sm:$0xff]  }
 0x139   :  { %1382 = vmatprep.subr.bf16.mxu0 %v2142_v2  ;;  %1419 = vmatprep.subr.bf16.mxu1 %v2145_v3  ;;  %v2214_v2 = vld [vmem:[#allocation6 + $0x178] ss:$20 sps:$4 sm:$0xff]  }
 0x13a   :  { %v2216_v3 = vld [vmem:[#allocation6 + $0x38] ss:$20 sps:$4 sm:$0xff]  }
 0x13c   :  { %1383 = vmatpush2.bf16.msra.mxu0 %v2140_v4  ;;  %1420 = vmatpush1.bf16.msra.mxu1 %v2143_v5  ;;  %v2217_v4 = vld [vmem:[#allocation6 + $0x308] ss:$20 sps:$4 sm:$0xff]   ;;  %v2218_v5 = vld [vmem:[#allocation6 + $0x150] ss:$20 sps:$4 sm:$0xff]  }
 0x13d   :  { %1384 = vmatprep.subr.bf16.mxu0 %v2148_v6  ;;  %1421 = vmatprep.subr.bf16.mxu1 %v2151_v7  ;;  %v2219_v6 = vld [vmem:[#allocation6 + $0x420] ss:$20 sps:$4 sm:$0xff]   ;;  %v2220_v7 = vld [vmem:[#allocation6 + $0x10] ss:$20 sps:$4 sm:$0xff]  }
 0x140   :  { %1385 = vmatpush2.bf16.msra.mxu0 %v2146_v8  ;;  %1422 = vmatpush1.bf16.msra.mxu1 %v2149_v9  ;;  %v2221_v8 = vld [vmem:[#allocation6 + $0x2e0] ss:$20 sps:$4 sm:$0xff]   ;;  %v2222_v9 = vld [vmem:[#allocation6 + $0x3f8] ss:$20 sps:$4 sm:$0xff]  }
 0x141   :  { %1386 = vmatprep.subr.bf16.mxu0 %v2154_v12  ;;  %1423 = vmatprep.subr.bf16.mxu1 %v2157_v14  ;;  %v2226_v12 = vld [vmem:[#allocation7 + $0x78] sm:$0xff]  }
 0x142   :  { %v2223_v14 = vld [vmem:[#allocation6 + $0x2b8] ss:$20 sps:$4 sm:$0xff]  }
 0x144   :  { %1387 = vmatpush2.bf16.msra.mxu0 %v2152_v15  ;;  %1424 = vmatpush2.bf16.msra.mxu1 %v2155_v16  ;;  %v2227_v15 = vld [vmem:[#allocation7 + $0x38] sm:$0xff]   ;;  %v2224_v16 = vld [vmem:[#allocation6 + $0x3d0] ss:$20 sps:$4 sm:$0xff]  }
 0x145   :  { %1388 = vmatprep.subr.bf16.mxu0 %v2160_v17  ;;  %1425 = vmatprep.subr.bf16.mxu1 %v2163_v19  ;;  %v2228_v17 = vld [vmem:[#allocation7 + $0x70] sm:$0xff]  }
 0x146   :  { %v2225_v19 = vld [vmem:[#allocation6 + $0x290] ss:$20 sps:$4 sm:$0xff]  }
 0x148   :  { %1389 = vmatpush2.bf16.msra.mxu0 %v2158_v20  ;;  %1426 = vmatpush2.bf16.msra.mxu1 %v2161_v22  ;;  %v2229_v20 = vld [vmem:[#allocation7 + $0x30] sm:$0xff]   ;;  %v2230_v22 = vld [vmem:[#allocation7 + $0x68] sm:$0xff]  }
 0x149   :  { %1390 = vmatprep.subr.bf16.mxu0 %v2166_v23  ;;  %1427 = vmatprep.subr.bf16.mxu1 %v2169_v24  ;;  %v2231_v23 = vld [vmem:[#allocation7 + $0x28] sm:$0xff]   ;;  %v2232_v24 = vld [vmem:[#allocation7 + $0x60] sm:$0xff]  }
 0x14c   :  { %1391 = vmatpush2.bf16.msra.mxu0 %v2164_v25  ;;  %1428 = vmatpush2.bf16.msra.mxu1 %v2167_v26  ;;  %v2233_v25 = vld [vmem:[#allocation7 + $0x20] sm:$0xff]   ;;  %v2234_v26 = vld [vmem:[#allocation7 + $0x58] sm:$0xff]  }
 0x14d   :  { %1392 = vmatprep.subr.bf16.mxu0 %v2172_v27  ;;  %1429 = vmatprep.subr.bf16.mxu1 %v2175_v28  ;;  %v2236_v27 = vld [vmem:[#allocation7 + $0x50] sm:$0xff]  }
 0x14e   :  { %v2237_v28 = vld [vmem:[#allocation7 + $0x10] sm:$0xff]  }
 0x150   :  { %1393 = vmatpush2.bf16.msra.mxu0 %v2170_v29  ;;  %1430 = vmatpush2.bf16.msra.mxu1 %v2173_v30  ;;  %v2238_v29 = vld [vmem:[#allocation7 + $0x48] sm:$0xff]  }
 0x151   :  { %1394 = vmatprep.subr.bf16.mxu0 %v2178_v31  ;;  %1431 = vmatprep.subr.bf16.mxu1 %v2181_v32  ;;  %v2239_v30 = vld [vmem:[#allocation7 + $0x8] sm:$0xff]   ;;  %v2240_v31 = vld [vmem:[#allocation7 + $0x40] sm:$0xff]  }
 0x152   :  { %v2241_v32 = vld [vmem:[#allocation7] sm:$0xff]  }
 0x154   :  { %1395 = vmatpush2.bf16.msra.mxu0 %v2176_v33  ;;  %1432 = vmatpush2.bf16.msra.mxu1 %v2179_v35 }
 0x155   :  { %1396 = vmatprep.subr.bf16.mxu0 %v2184_v37  ;;  %1433 = vmatprep.subr.bf16.mxu1 %v2187_v38 }
 0x158   :  { %1397 = vmatpush2.bf16.msra.mxu0 %v2182_v39  ;;  %1434 = vmatpush2.bf16.msra.mxu1 %v2185_v40 }
 0x159   :  { %1435 = vmatprep.subr.bf16.mxu1 %v2190_v41  ;;  %1918 = vmatprep.subr.bf16.mxu0 %v2191_v43 }
 0x15b   :  { %1399 = vmatmul.mubr.bf16.vlgmr.msra.gmra.mxu0 %v2458_v36 }
 0x15c   :  { %1436 = vmatpush2.bf16.msra.mxu1 %v2188_v44  ;;  %1919 = vmatpush3.bf16.msra.mxu0 %v2192_v46 }
 0x15d   :  { %1480 = vmatprep.mubr.bf16.mxu0 %v2456_v34  ;;  %1437 = vmatprep.subr.bf16.mxu1 %v2195_v47  ;;  %v2206_v34 = vld [vmem:[#allocation6 + $0x1c8] ss:$20 sps:$4 sm:$0xff]  }
 0x15e   :  { %1920 = vmatprep.subr.bf16.mxu0 %v2196_v48 }
 0x160   :  { %1438 = vmatpush2.bf16.msra.mxu1 %v2193_v49  ;;  %1921 = vmatpush3.bf16.msra.mxu0 %v2197_v50 }
 0x161   :  { %1922 = vmatprep.subr.bf16.mxu0 %v2198_v51  ;;  %1940 = vmatprep.subr.bf16.mxu1 %v2199_v52 }
 0x163   :  { %1440 = vmatmul.mubr.bf16.vlgmr.msra.gmra.mxu1 %v2465_v45 }
 0x164   :  { %1923 = vmatpush3.bf16.msra.mxu0 %v2200_v53  ;;  %1941 = vmatpush3.bf16.msra.mxu1 %v2201_v54 }
 0x165   :  { %1520 = vmatprep.mubr.bf16.mxu1 %v2463_v42  ;;  %1924 = vmatprep.subr.bf16.mxu0 %v2202_v55  ;;  %v2215_v42 = vld [vmem:[#allocation6 + $0x448] ss:$20 sps:$4 sm:$0xff]  }
 0x166   :  { %1942 = vmatprep.subr.bf16.mxu1 %v2203_v56 }
 0x168   :  { %1925 = vmatpush3.bf16.msra.mxu0 %v2204_v57  ;;  %1943 = vmatpush3.bf16.msra.mxu1 %v2205_v58 }
 0x169   :  { %1926 = vmatprep.subr.bf16.mxu0 %v2206_v34  ;;  %1944 = vmatprep.subr.bf16.mxu1 %v2207_v59 }
 0x16c   :  { %1927 = vmatpush3.bf16.msra.mxu0 %v2208_v60  ;;  %1945 = vmatpush3.bf16.msra.mxu1 %v2209_v61 }
 0x16d   :  { %1928 = vmatprep.subr.bf16.mxu0 %v2210_v62  ;;  %1946 = vmatprep.subr.bf16.mxu1 %v2211_v63 }
 0x170   :  { %1929 = vmatpush3.bf16.msra.mxu0 %v2212_v0  ;;  %1947 = vmatpush3.bf16.msra.mxu1 %v2213_v1 }
 0x171   :  { %1930 = vmatprep.subr.bf16.mxu0 %v2214_v2  ;;  %1948 = vmatprep.subr.bf16.mxu1 %v2215_v42  ;;  %v445_v42 = vsub.s32 4, %v2439_v10 }
 0x174   :  { %1931 = vmatpush3.bf16.msra.mxu0 %v2216_v3  ;;  %1949 = vmatpush3.bf16.msra.mxu1 %v2217_v4 }
 0x175   :  { %1932 = vmatprep.subr.bf16.mxu0 %v2218_v5  ;;  %1950 = vmatprep.subr.bf16.mxu1 %v2219_v6 }
 0x178   :  { %1933 = vmatpush3.bf16.msra.mxu0 %v2220_v7  ;;  %1951 = vmatpush3.bf16.msra.mxu1 %v2221_v8 }
 0x179   :  { %1952 = vmatprep.subr.bf16.mxu1 %v2222_v9  ;;  %1962 = vmatprep.subr.bf16.mxu0 %v2226_v12 }
 0x17b   :  { %1481 = vmatmul.mubr.bf16.vlgmr.msra.gmra.mxu0 %v2458_v36  ;;  %v2235_v36 = vld [vmem:[#allocation7 + $0x18] sm:$0xff]  }
 0x17c   :  { %1953 = vmatpush3.bf16.msra.mxu1 %v2223_v14  ;;  %1963 = vmatpush3.bf16.msra.mxu0 %v2227_v15 }
 0x17d   :  { %1954 = vmatprep.subr.bf16.mxu1 %v2224_v16  ;;  %1964 = vmatprep.subr.bf16.mxu0 %v2228_v17 }
 0x180   :  { %1955 = vmatpush3.bf16.msra.mxu1 %v2225_v19  ;;  %1965 = vmatpush3.bf16.msra.mxu0 %v2229_v20 }
 0x181   :  { %1966 = vmatprep.subr.bf16.mxu0 %v2230_v22 }
 0x183   :  { %1521 = vmatmul.mubr.bf16.vlgmr.msra.gmra.mxu1 %v2465_v45  ;;  %v425_v45 = vld [vmem:[%s2504_s4] sm:$0x1f] }
 0x184   :  { %1967 = vmatpush3.bf16.msra.mxu0 %v2231_v23  ;;  %v430_v37 = vrot.slane %v425_v45, %v101_v11  ;;  %v434_v39 = vrot.slane %v425_v45, %v105_v13  ;;  %v438_v13 = vrot.slane %v425_v45, %v109_v18  ;;  %v442_v57 = vrot.slane %v425_v45, %v113_v21 }
 0x185   :  { %1968 = vmatprep.subr.bf16.mxu0 %v2232_v24  ;;  %v446_v4 = vrot.slane %v425_v45, %v445_v42 }
 0x188   :  { %1969 = vmatpush3.bf16.msra.mxu0 %v2233_v25  ;;  %v1900_v25 = vld [vmem:[#allocation9] ss:$0 sm:$0xff] }
 0x189   :  { %1970 = vmatprep.subr.bf16.mxu0 %v2234_v26 }
 0x18c   :  { %1971 = vmatpush3.bf16.msra.mxu0 %v2235_v36 }
 0x18d   :  { %1972 = vmatprep.subr.bf16.mxu0 %v2236_v27 }
 0x190   :  { %1973 = vmatpush3.bf16.msra.mxu0 %v2237_v28 }
 0x191   :  { %1974 = vmatprep.subr.bf16.mxu0 %v2238_v29 }
 0x194   :  { %1975 = vmatpush3.bf16.msra.mxu0 %v2239_v30 }
 0x195   :  { %1976 = vmatprep.subr.bf16.mxu0 %v2240_v31 }
 0x198   :  { %1977 = vmatpush3.bf16.msra.mxu0 %v2241_v32 }
 0x1db   :  { %v1318_v33 = vpop.f32.mrf.mxu0 }
 0x1dc   :  { %v1319_v41 = vadd.f32 %v1318_v33, %v430_v37 }
 0x1dd   :  { %v1320_v35 = vpop.f32.mrf.mxu0 }
 0x1de   :  { %v1321_v44 = vadd.f32 %v1320_v35, %v434_v39 }
 0x1df   :  { %v1322_v38 = vpop.f32.mrf.mxu0 }
 0x1e1   :  { %v1323_v40 = vpop.f32.mrf.mxu0 }
 0x1e3   :  { %v1359_v43 = vpop.f32.mrf.mxu1 }
 0x1e4   :  { %v1360_v46 = vadd.f32 %v1359_v43, %v1319_v41 }
 0x1e5   :  { %v1361_v47 = vpop.f32.mrf.mxu1 }
 0x1e6   :  { %v1362_v48 = vadd.f32 %v1361_v47, %v1321_v44  ;;  %2250 = vtanh.f32 %v1360_v46 }
 0x1e7   :  { %v1363_v49 = vpop.f32.mrf.mxu1 }
 0x1e8   :  { %2252 = vtanh.f32 %v1362_v48 }
 0x1e9   :  { %v1364_v50 = vpop.f32.mrf.mxu1 }
 0x1f3   :  { %v2251_v51 = vpop.eup %2250 }
 0x1f4   :  { %v1562_v54 = vpack.c.bf16 %v2251_v51, %v2251_v51 }
 0x1f5   :  { %v2253_v52 = vpop.eup %2252 }
 0x1f6   :  { %v1563_v53 = vpack.c.bf16 %v2253_v52, %v2253_v52 }
 0x1f8   :  { %1699 = vmatprep.mubr.bf16.mxu0 %v1563_v53 }
 0x1f9   :  { %1700 = vmatmul.mubr.bf16.vlgmr.msra.gmra.mxu0 %v1562_v54 }
 0x21b   :  { %v1400_v11 = vpop.f32.mrf.mxu0 }
 0x21c   :  { %v1401_v34 = vadd.f32 %v1400_v11, %v438_v13 }
 0x21d   :  { %v1402_v55 = vpop.f32.mrf.mxu0 }
 0x21e   :  { %v1403_v60 = vadd.f32 %v1402_v55, %v442_v57 }
 0x21f   :  { %v1404_v56 = vpop.f32.mrf.mxu0 }
 0x221   :  { %v1405_v58 = vpop.f32.mrf.mxu0 }
 0x223   :  { %v1441_v59 = vpop.f32.mrf.mxu1 }
 0x224   :  { %v1442_v61 = vadd.f32 %v1441_v59, %v1401_v34 }
 0x225   :  { %v1443_v62 = vpop.f32.mrf.mxu1 }
 0x226   :  { %1724 = vst [vmem:[%s2507_s7 + $0x8] sm:$0xff] %v1442_v61  ;;  %v1444_v63 = vadd.f32 %v1443_v62, %v1403_v60 }
 0x227   :  { %v1445_v0 = vpop.f32.mrf.mxu1 }
 0x228   :  { %1708 = vmax.xlane.f32.xlu0 %v1444_v63 }
 0x229   :  { %v1446_v1 = vpop.f32.mrf.mxu1 }
 0x23b   :  { %v1934_v2 = vpop.f32.mrf.mxu0 }
 0x23d   :  { %v1935_v18 = vpop.f32.mrf.mxu0 }
 0x23e   :  { %v1936_v5 = vadd.f32 %v1935_v18, %v1934_v2 }
 0x23f   :  { %v1937_v3 = vpop.f32.mrf.mxu0 }
 0x240   :  { %v1483_v8 = vadd.f32 %v1936_v5, %v446_v4 }
 0x241   :  { %v1938_v21 = vpop.f32.mrf.mxu0 }
 0x243   :  { %v1956_v6 = vpop.f32.mrf.mxu1 }
 0x245   :  { %v1957_v7 = vpop.f32.mrf.mxu1 }
 0x246   :  { %v1958_v9 = vadd.f32 %v1957_v7, %v1956_v6 }
 0x247   :  { %v1959_v12 = vpop.f32.mrf.mxu1 }
 0x248   :  { %v1523_v14 = vadd.f32 %v1958_v9, %v1483_v8 }
 0x249   :  { %v1960_v15 = vpop.f32.mrf.mxu1 }
 0x24a   :  { %v1917_v16 = vmul.f32 -1.442695, %v1523_v14 }
 0x24c   :  { %2254 = vpow2.f32 %v1917_v16 }
 0x259   :  { %v2255_v17 = vpop.eup %2254 }
 0x25a   :  { %v1720_v19 = vadd.f32 1.0, %v2255_v17 }
 0x25c   :  { %2256 = vrcp.f32 %v1720_v19 }
 0x269   :  { %v2257_v20 = vpop.eup %2256 }
 0x26a   :  { %1726 = vst [vmem:[%s2507_s7 + $0x18] sm:$0xff] %v2257_v20 }
 0x2b1   :  { %v1709_v10 = vpop.xlane.xlu0 %1708 }
 0x2b2   :  { %v1710_v22 = vsub.f32 %v1444_v63, %v1709_v10 }
 0x2b4   :  { %v1711_v23 = vmul.f32 1.442695, %v1710_v22 }
 0x2b6   :  { %2258 = vpow2.f32 %v1711_v23 }
 0x2b9   :  { %v1978_v24 = vpop.f32.mrf.mxu0 }
 0x2bb   :  { %v1979_v26 = vpop.f32.mrf.mxu0 }
 0x2bc   :  { %v1980_v36 = vadd.f32 %v1979_v26, %v1978_v24 }
 0x2bd   :  { %v1981_v27 = vpop.f32.mrf.mxu0 }
 0x2be   :  { %v1702_v28 = vadd.f32 %v1980_v36, %v1900_v25 }
 0x2bf   :  { %v1982_v29 = vpop.f32.mrf.mxu0 }
 0x2c0   :  { %2260 = vtanh.f32 %v1702_v28 }
 0x2c3   :  { %v2259_v30 = vpop.eup %2258 }
 0x2c4   :  { %1713 = vadd.xlane.f32.xlu0 %v2259_v30 }
 0x2cd   :  { %v2261_v31 = vpop.eup %2260 }
 0x2ce   :  { %1723 = vst [vmem:[%s2507_s7] sm:$0xff] %v2261_v31 }
 0x34d   :  { %v1714_v32 = vpop.xlane.xlu0 %1713 }
 0x34e   :  { %2262 = vrcp.f32 %v1714_v32 }
 0x35b   :  { %v2263_v45 = vpop.eup %2262 }
 0x35c   :  { %v1716_v33 = vmul.f32 %v2263_v45, %v2259_v30 }
 0x35e   :  { %1725 = vst [vmem:[%s2507_s7 + $0x10] sm:$0xff] %v1716_v33 }
 0x35f   :  { %1731 = vsyncpa [#allocation3], 1 }
 0x360   :  { %1732 = vsyncpa [#allocation5], 1 }
 0x361   :  { %1733 = vsyncpa [#allocation8], 1 }

</bundles_post_ra>
